<compile_context>
chip_gen: v7x
topology: tpu7x:2x2x1
jax: 0.10.0
libtpu: 0.0.40
codegen_flags: <defaults>
</compile_context>

<pallas_src>
import re

import jax
import jax.numpy as jnp
from jax.experimental import pallas as pl
from jax.experimental.pallas import tpu as pltpu

NUM_CLASSES = 155
NUM_FUNC_CLASSES = 2
OUT_PAD = 256  # lane-dense output slab (>= 155 + 2, multiple of 128)


def _tpu_generation():
    """Best-effort TPU generation number (5 for v5e/v5p, 6 for v6e, 7 for v7x)."""
    try:
        kind = jax.devices()[0].device_kind.lower()
        m = re.search(r"v(\d+)", kind)
        if m:
            return int(m.group(1))
    except Exception:
        pass
    return 0  # unknown -> conservative f32 tanh


def _make_kernel(bf16_tanh):
    def kernel(cls_ref, w1_ref, b1_ref, w2_ref, b2_ref, out_ref):
        # cls_ref: [TB, H]  f32         w1_ref: [H, 2H]       bf16 (resident)
        # b1_ref : [1, 2H]  f32         w2_ref: [2H, OUT_PAD] bf16 (resident)
        # b2_ref : [1, OUT_PAD] f32     out_ref: [TB, OUT_PAD] f32
        cls = cls_ref[...].astype(jnp.bfloat16)  # bf16 cast inside kernel (VPU)
        h = jnp.dot(cls, w1_ref[...],
                    preferred_element_type=jnp.float32) + b1_ref[...]
        if bf16_tanh:
            # v6e/v7x: bf16 EUP tanh (~2x f32 rate); feeds a bf16 matmul anyway.
            h = jnp.tanh(h.astype(jnp.bfloat16))
        else:
            # v5e and older: no bf16 EUP — keep tanh in f32, cast afterwards.
            h = jnp.tanh(h).astype(jnp.bfloat16)
        out = jnp.dot(h, w2_ref[...],
                      preferred_element_type=jnp.float32) + b2_ref[...]
        out_ref[...] = out.astype(out_ref.dtype)
    return kernel


def prepare_params(params):
    """One-time packing of nn.Linear-style params (weights stored [out, in])
    into the fused, pre-transposed, bf16 layout consumed by the kernel."""
    H = params["dense_w"].shape[0]

    # First layer: [H, 2H] = [dense.T | func_dense.T], biases concatenated.
    w1 = jnp.concatenate([params["dense_w"].T, params["func_dense_w"].T], axis=1)
    b1 = jnp.concatenate([params["dense_b"], params["func_dense_b"]])[None, :]

    # Second layer: block-diagonal [2H, OUT_PAD].
    #   rows [0:H]  -> class-logit columns [0:155]
    #   rows [H:2H] -> func-logit  columns [155:157]
    w2 = jnp.zeros((2 * H, OUT_PAD), jnp.float32)
    w2 = w2.at[:H, :NUM_CLASSES].set(params["out_proj_w"].T)
    w2 = w2.at[H:, NUM_CLASSES:NUM_CLASSES + NUM_FUNC_CLASSES].set(
        params["func_out_proj_w"].T)
    b2 = jnp.zeros((OUT_PAD,), jnp.float32)
    b2 = b2.at[:NUM_CLASSES].set(params["out_proj_b"])
    b2 = b2.at[NUM_CLASSES:NUM_CLASSES + NUM_FUNC_CLASSES].set(
        params["func_out_proj_b"])

    return {
        "w1": w1.astype(jnp.bfloat16),
        "b1": b1.astype(jnp.float32),
        "w2": w2.astype(jnp.bfloat16),
        "b2": b2[None, :].astype(jnp.float32),
    }


def _round_up(x, m):
    return (x + m - 1) // m * m


def _choose_tb(B):
    """Batch tile: multiple of 16, large at big B (amortize per-step overhead),
    and >= 2 grid steps when B allows so "parallel" can shard the batch axis
    across v7x's two TensorCores."""
    if B <= 16:
        return 16
    tb = _round_up((B + 1) // 2, 16)
    return min(512, tb)


@jax.jit
def classification_head(hidden, packed):
    """hidden: [B, S, H] float32. packed: output of prepare_params (call once).

    Returns (logits [B, 155], func_logits [B, 2]) matching the PyTorch forward
    (x.squeeze(-1) is a no-op since the last dim is 155 != 1)."""
    B, S, H = hidden.shape
    assert packed["w1"].shape == (H, 2 * H)

    # CLS slice stays f32; bf16 cast happens inside the kernel; the slice
    # itself is allowed to fuse into the custom-call input (allow_input_fusion).
    cls = hidden[:, 0, :]

    TB = _choose_tb(B)
    grid = (pl.cdiv(B, TB),)  # no jnp.pad: Pallas masks the boundary block

    flops = 2 * B * (H * 2 * H + 2 * H * OUT_PAD)
    bytes_accessed = (B * H * 4                               # cls (f32 in)
                      + packed["w1"].size * 2 + packed["w2"].size * 2
                      + packed["b1"].size * 4 + packed["b2"].size * 4
                      + B * OUT_PAD * 4)                      # output (f32)

    # Resident (single-buffered) weights + double-buffered cls / out tiles.
    weight_vmem = (packed["w1"].size * 2 + packed["w2"].size * 2
                   + packed["b1"].size * 4 + packed["b2"].size * 4)
    tile_vmem = 2 * TB * (H * 4 + OUT_PAD * 4)
    vmem_needed = weight_vmem + tile_vmem
    # H >= ~1024 regime: raise the scoped-VMEM limit explicitly once resident
    # weights outgrow the conservative default; keep headroom, stay < physical.
    vmem_limit = None
    if vmem_needed > (12 << 20):
        vmem_limit = min(int(vmem_needed * 1.5) + (4 << 20), 96 << 20)

    kernel = _make_kernel(bf16_tanh=_tpu_generation() >= 6)

    # Whole-array VMEM residency == single-buffered invariant operands
    # (one DMA before the grid, no per-step double-buffering).
    resident = pl.BlockSpec(memory_space=pltpu.MemorySpace.VMEM)

    out = pl.pallas_call(
        kernel,
        out_shape=jax.ShapeDtypeStruct((B, OUT_PAD), jnp.float32),
        grid=grid,
        in_specs=[
            pl.BlockSpec((TB, H), lambda i: (i, 0)),   # cls tile (pipelined)
            resident,                                  # w1
            resident,                                  # b1
            resident,                                  # w2
            resident,                                  # b2
        ],
        out_specs=pl.BlockSpec((TB, OUT_PAD), lambda i: (i, 0)),
        compiler_params=pltpu.CompilerParams(
            dimension_semantics=("parallel",),
            allow_input_fusion=[True, False, False, False, False],
            vmem_limit_bytes=vmem_limit),
        cost_estimate=pl.CostEstimate(
            flops=flops,
            transcendentals=B * 2 * H,
            bytes_accessed=bytes_accessed),
    )(cls, packed["w1"], packed["b1"], packed["w2"], packed["b2"])

    logits = out[:, :NUM_CLASSES]
    func_logits = out[:, NUM_CLASSES:NUM_CLASSES + NUM_FUNC_CLASSES]
    return logits, func_logits


def init_params(key, hidden_dim):
    """Deterministic synthetic init mirroring nn.Linear default U(-1/sqrt(in), 1/sqrt(in))."""
    ks = jax.random.split(key, 8)
    bound = 1.0 / jnp.sqrt(hidden_dim)

    def u(k, shape):
        return jax.random.uniform(k, shape, jnp.float32, -bound, bound)

    return {
        "dense_w": u(ks[0], (hidden_dim, hidden_dim)),
        "dense_b": u(ks[1], (hidden_dim,)),
        "out_proj_w": u(ks[2], (NUM_CLASSES, hidden_dim)),
        "out_proj_b": u(ks[3], (NUM_CLASSES,)),
        "func_dense_w": u(ks[4], (hidden_dim, hidden_dim)),
        "func_dense_b": u(ks[5], (hidden_dim,)),
        "func_out_proj_w": u(ks[6], (NUM_FUNC_CLASSES, hidden_dim)),
        "func_out_proj_b": u(ks[7], (NUM_FUNC_CLASSES,)),
    }


def _reference(hidden, params, bf16=False, bf16_tanh=False):
    """Pure-JAX reference. bf16=True mimics the kernel's operand precision
    (bf16 weights/activations into the matmuls, f32 accumulation/bias);
    bf16_tanh=True additionally mimics the bf16 tanh used on v6e/v7x."""
    q = (lambda a: a.astype(jnp.bfloat16).astype(jnp.float32)) if bf16 else (lambda a: a)

    def act(pre):
        if bf16_tanh:
            return jnp.tanh(pre.astype(jnp.bfloat16)).astype(jnp.float32)
        return jnp.tanh(pre)

    cls = q(hidden[:, 0, :])
    x = q(act(cls @ q(params["dense_w"].T) + params["dense_b"]))
    logits = x @ q(params["out_proj_w"].T) + params["out_proj_b"]
    fx = q(act(cls @ q(params["func_dense_w"].T) + params["func_dense_b"]))
    func_logits = fx @ q(params["func_out_proj_w"].T) + params["func_out_proj_b"]
    return logits, func_logits


if __name__ == "__main__":
    key = jax.random.PRNGKey(0)
    k_hidden, k_params = jax.random.split(key)

    B, S, H = 2, 8, 32  # small shapes: batch=2, seq=8, hidden_dim=32
    hidden = jax.random.normal(k_hidden, (B, S, H), jnp.float32)
    params = init_params(k_params, H)
    packed = prepare_params(params)  # one-time weight packing (not per call)

    logits, func_logits = classification_head(hidden, packed)
    jax.block_until_ready((logits, func_logits))

    assert logits.shape == (B, NUM_CLASSES)
    assert func_logits.shape == (B, NUM_FUNC_CLASSES)

    # Tight check against a reference with matching (bf16 operand) numerics.
    bf16_tanh = _tpu_generation() >= 6
    ref_logits_bf, ref_func_bf = _reference(hidden, params, bf16=True,
                                            bf16_tanh=bf16_tanh)
    assert jnp.allclose(logits, ref_logits_bf, atol=1e-2, rtol=1e-2)
    assert jnp.allclose(func_logits, ref_func_bf, atol=1e-2, rtol=1e-2)

    # Looser sanity check against the full-f32 reference (bf16 quantization err).
    ref_logits, ref_func = _reference(hidden, params, bf16=False)
    assert jnp.allclose(logits, ref_logits, atol=1e-1, rtol=1e-1)
    assert jnp.allclose(func_logits, ref_func, atol=1e-1, rtol=1e-1)

    print("KERNEL_OK")
</pallas_src>

<mosaic_0001>
module attributes {stable_mosaic.version = 11 : i64} {
  func.func @kernel(%arg0: i32, %arg1: memref<16x32xf32, #tpu.memory_space<vmem>>, %arg2: memref<32x64xbf16, #tpu.memory_space<vmem>>, %arg3: memref<1x64xf32, #tpu.memory_space<vmem>>, %arg4: memref<64x256xbf16, #tpu.memory_space<vmem>>, %arg5: memref<1x256xf32, #tpu.memory_space<vmem>>, %arg6: memref<16x256xf32, #tpu.memory_space<vmem>>) attributes {dimension_semantics = [#tpu.dimension_semantics<parallel>], iteration_bounds = array<i64: 1>, scalar_prefetch = 0 : i64, scratch_operands = 0 : i64, tpu.core_type = #tpu.core_type<tc>, window_params = [{transform_indices = @transform_0, window_bounds = array<i64: 16, 32>}, {pipeline_mode = #tpu.pipeline_mode<synchronous>, transform_indices = @transform_1, window_bounds = array<i64: 32, 64>}, {pipeline_mode = #tpu.pipeline_mode<synchronous>, transform_indices = @transform_2, window_bounds = array<i64: 1, 64>}, {pipeline_mode = #tpu.pipeline_mode<synchronous>, transform_indices = @transform_3, window_bounds = array<i64: 64, 256>}, {pipeline_mode = #tpu.pipeline_mode<synchronous>, transform_indices = @transform_4, window_bounds = array<i64: 1, 256>}, {transform_indices = @transform_5, window_bounds = array<i64: 16, 256>}]} {
    %c0 = arith.constant 0 : index
    %c0_0 = arith.constant 0 : index
    %0 = vector.load %arg1[%c0, %c0_0] : memref<16x32xf32, #tpu.memory_space<vmem>>, vector<16x32xf32>
    %1 = arith.truncf %0 : vector<16x32xf32> to vector<16x32xbf16>
    %c0_1 = arith.constant 0 : index
    %c0_2 = arith.constant 0 : index
    %2 = vector.load %arg2[%c0_1, %c0_2] : memref<32x64xbf16, #tpu.memory_space<vmem>>, vector<32x64xbf16>
    %cst = arith.constant dense<0.000000e+00> : vector<16x64xf32>
    %3 = tpu.matmul %1, %2, %cst {dimension_numbers = #tpu.dot_dimension_numbers<[1], [0], [0], [1], [0, 0, 1, 1], [], []>} : vector<16x32xbf16>, vector<32x64xbf16>, vector<16x64xf32> -> vector<16x64xf32>
    %c0_3 = arith.constant 0 : index
    %c0_4 = arith.constant 0 : index
    %4 = vector.load %arg3[%c0_3, %c0_4] : memref<1x64xf32, #tpu.memory_space<vmem>>, vector<1x64xf32>
    %5 = vector.broadcast %4 : vector<1x64xf32> to vector<16x64xf32>
    %6 = arith.addf %3, %5 : vector<16x64xf32>
    %7 = math.tanh %6 : vector<16x64xf32>
    %8 = arith.truncf %7 : vector<16x64xf32> to vector<16x64xbf16>
    %c0_5 = arith.constant 0 : index
    %c0_6 = arith.constant 0 : index
    %9 = vector.load %arg4[%c0_5, %c0_6] : memref<64x256xbf16, #tpu.memory_space<vmem>>, vector<64x256xbf16>
    %cst_7 = arith.constant dense<0.000000e+00> : vector<16x256xf32>
    %10 = tpu.matmul %8, %9, %cst_7 {dimension_numbers = #tpu.dot_dimension_numbers<[1], [0], [0], [1], [0, 0, 1, 1], [], []>} : vector<16x64xbf16>, vector<64x256xbf16>, vector<16x256xf32> -> vector<16x256xf32>
    %c0_8 = arith.constant 0 : index
    %c0_9 = arith.constant 0 : index
    %11 = vector.load %arg5[%c0_8, %c0_9] : memref<1x256xf32, #tpu.memory_space<vmem>>, vector<1x256xf32>
    %12 = vector.broadcast %11 : vector<1x256xf32> to vector<16x256xf32>
    %13 = arith.addf %10, %12 : vector<16x256xf32>
    %c0_10 = arith.constant 0 : index
    %c0_11 = arith.constant 0 : index
    %14 = vector.load %arg6[%c0_10, %c0_11] : memref<16x256xf32, #tpu.memory_space<vmem>>, vector<16x256xf32>
    tpu.vector_store %arg6[%c0_10, %c0_11], %13 {strides = array<i32>} : memref<16x256xf32, #tpu.memory_space<vmem>>, vector<16x256xf32>,
    return
  }
  func.func @transform_0(%arg0: i32) -> (i32, i32) {
    %c0_i32 = arith.constant 0 : i32
    %c0_i32_0 = arith.constant 0 : i32
    return %arg0, %c0_i32 : i32, i32
  }
  func.func @transform_1(%arg0: i32) -> (i32, i32) {
    %c0_i32 = arith.constant 0 : i32
    %c0_i32_0 = arith.constant 0 : i32
    %c0_i32_1 = arith.constant 0 : i32
    return %c0_i32, %c0_i32_0 : i32, i32
  }
  func.func @transform_2(%arg0: i32) -> (i32, i32) {
    %c0_i32 = arith.constant 0 : i32
    %c0_i32_0 = arith.constant 0 : i32
    %c0_i32_1 = arith.constant 0 : i32
    return %c0_i32, %c0_i32_0 : i32, i32
  }
  func.func @transform_3(%arg0: i32) -> (i32, i32) {
    %c0_i32 = arith.constant 0 : i32
    %c0_i32_0 = arith.constant 0 : i32
    %c0_i32_1 = arith.constant 0 : i32
    return %c0_i32, %c0_i32_0 : i32, i32
  }
  func.func @transform_4(%arg0: i32) -> (i32, i32) {
    %c0_i32 = arith.constant 0 : i32
    %c0_i32_0 = arith.constant 0 : i32
    %c0_i32_1 = arith.constant 0 : i32
    return %c0_i32, %c0_i32_0 : i32, i32
  }
  func.func @transform_5(%arg0: i32) -> (i32, i32) {
    %c0_i32 = arith.constant 0 : i32
    %c0_i32_0 = arith.constant 0 : i32
    return %arg0, %c0_i32 : i32, i32
  }
}

</mosaic_0001>

<bundles_post_ra>
// kernel: classification_head.1
= control target key start
LH: loop header
LB: loop body
LE: loop exit
PB: predicated region body
PF: predicated region fallthrough
CT: control target
= control target key end

     0   :  { %10 = vsyncpa [#allocation3], 0  ;;  %s506_s0 = inlined_call_operand.vmem [shape: f32[2,32], index: 0, kind: input, shape index: {}]   ;;  %s507_s1 = inlined_call_operand.vmem [shape: bf16[32,64], index: 1, kind: input, shape index: {}]   ;;  %s508_s2 = inlined_call_operand.vmem [shape: f32[1,64], index: 2, kind: input, shape index: {}]   ;;  %s509_s3 = inlined_call_operand.hbm [shape: bf16[64,256], index: 3, kind: input, shape index: {}]   ;;  %s510_s4 = inlined_call_operand.hbm [shape: f32[1,256], index: 4, kind: input, shape index: {}]   ;;  %s511_s5 = inlined_call_operand.vmem [shape: f32[2,256], index: 5, kind: output, shape index: {}]  }
   0x1   :  { %11 = vsyncpa [#allocation5], 0  ;;  %s427_s18 = smov [#allocation2]   ;;  %s379_s22 = scalar_lea.hbm %s509_s3, 1024 }
   0x2   :  { %s23_s19 = sshll.u32 %s427_s18, 4  ;;  %p380_p0 = scmp.ne.s32.totalorder %s509_s3, %s379_s22  ;;  %s24_s19 = int_to_ptr.vmem [resolvable:$true] %s23_s19 }
   0x3   :  { %p383_p1 = scmp.lt.u32.totalorder %s379_s22, %s509_s3 }
   0x5   :  { %p385_p2 = pnand %p383_p1, %p380_p0 }
   0x7   :  { %388 = shalt.err (!%p385_p2)
}
   0x8   :  { %s389_s27 = scalar_lea.vmem %s24_s19, 1024  ;;  %p394_p4 = scmp.lt.s32.totalorder %s24_s19, %s24_s19 }
   0x9   :  { %p390_p3 = scmp.ne.s32.totalorder %s24_s19, %s389_s27  ;;  %p395_p5 = scmp.lt.s32.totalorder %s389_s27, %s389_s27 }
   0xb   :  { %p396_p6 = por %p395_p5, %p394_p4 }
   0xd   :  { %p397_p7 = pnand %p396_p6, %p390_p3 }
   0xf   :  { %400 = shalt.err (!%p397_p7)
}
  0x10   :  { %s428_s28 = smov 128   ;;  %s429_s29 = smov 8  }
  0x11   :  { %29 = dma.hbm_to_vmem [thread:$0]  %s509_s3, 1024, %s24_s19, [#allocation3], %s428_s28, %s428_s28, %s429_s29  }
  0x12   :  { %s430_s7 = smov [#allocation4]   ;;  %s401_s11 = scalar_lea.hbm %s510_s4, 32 }
  0x13   :  { %s36_s8 = sshll.u32 %s430_s7, 4  ;;  %p402_p8 = scmp.ne.s32.totalorder %s510_s4, %s401_s11  ;;  %s37_s8 = int_to_ptr.vmem [resolvable:$true] %s36_s8 }
  0x14   :  { %p405_p9 = scmp.lt.u32.totalorder %s401_s11, %s510_s4 }
  0x16   :  { %p407_p10 = pnand %p405_p9, %p402_p8 }
  0x18   :  { %410 = shalt.err (!%p407_p10)
}
  0x19   :  { %s411_s16 = scalar_lea.vmem %s37_s8, 32  ;;  %p416_p12 = scmp.lt.s32.totalorder %s37_s8, %s37_s8 }
  0x1a   :  { %p412_p11 = scmp.ne.s32.totalorder %s37_s8, %s411_s16  ;;  %p417_p13 = scmp.lt.s32.totalorder %s411_s16, %s411_s16 }
  0x1c   :  { %p418_p0 = por %p417_p13, %p416_p12 }
  0x1e   :  { %p419_p1 = pnand %p418_p0, %p412_p11 }
  0x20   :  { %422 = shalt.err (!%p419_p1)
}
  0x21   :  { %39 = dma.hbm_to_vmem [thread:$0]  %s510_s4, 32, %s37_s8, [#allocation5]  }
  0x22   :  { %423 = dma.done.wait [#allocation3], 1024  }
  0x23   :  { %424 = vsyncadd [#allocation3], 4294966272 }
  0x24   :  { %425 = dma.done.wait [#allocation5], 32  }
  0x25   :  { %426 = vsyncadd [#allocation5], 4294967264  ;;  %v431_v0 = vmov 0.0   ;;  %vm432_vm0 = vmmov 0   ;;  %v361_v1 = vld [vmem:[%s507_s1] sm:$0xff]   ;;  %v362_v2 = vld [vmem:[%s507_s1 + $0x8] sm:$0xff]   ;;  %v131_v25 = vlaneseq }
  0x26   :  { %345 = vmatprep.subr.bf16.mxu0 %v431_v0  ;;  %349 = vmatprep.mubr.msk.bf16.mxu0 %vm432_vm0, %v431_v0  ;;  %v47_v3 = vld [vmem:[%s506_s0] sm:$0xff]  ;;  %v48_v4 = vld [vmem:[%s506_s0 + $0x8] sm:$0xff]  ;;  %vm73_vm1 = vcmask 261120   ;;  %v366_v8 = vld [vmem:[#allocation2 + $0x14] ss:$8 sps:$4 sm:$0xff]   ;;  %v433_v12 = vmov 0  }
  0x27   :  { %346 = vmatpush3.bf16.msra.mxu0 %v361_v1  ;;  %v49_v5 = vpack.c.bf16 %v48_v4, %v47_v3  ;;  %v363_v6 = vld [vmem:[#allocation2 + $0x4] ss:$8 sps:$4 sm:$0xff]   ;;  %v365_v7 = vld [vmem:[#allocation2] ss:$8 sps:$4 sm:$0xff]   ;;  %v368_v9 = vld [vmem:[#allocation2 + $0x10] ss:$8 sps:$4 sm:$0xff]   ;;  %217 = vmatprep.mubr.bf16.mxu1 %v433_v12 }
  0x28   :  { %347 = vmatprep.subr.bf16.mxu0 %v431_v0  ;;  %185 = vmatprep.subr.bf16.mxu1 %v363_v6  ;;  %v369_v10 = vld [vmem:[#allocation2 + $0x24] ss:$8 sps:$4 sm:$0xff]   ;;  %v371_v11 = vld [vmem:[#allocation2 + $0x20] ss:$8 sps:$4 sm:$0xff]   ;;  %v372_v13 = vld [vmem:[#allocation2 + $0x34] ss:$8 sps:$4 sm:$0xff]  }
  0x29   :  { %186 = vmatpush1.bf16.msra.mxu1 %v365_v7  ;;  %v374_v14 = vld [vmem:[#allocation2 + $0x30] ss:$8 sps:$4 sm:$0xff]   ;;  %v325_v15 = vld [vmem:[%s508_s2] ss:$0 sm:$0xff]  ;;  %vm181_vm2 = vcmask 523264   ;;  %v132_v26 = vshrl.u32 %v131_v25, 7 }
  0x2a   :  { %187 = vmatprep.subr.bf16.mxu1 %v366_v8  ;;  %v129_v28 = vld [vmem:[#allocation4] sm:$0x3] }
  0x2b   :  { %348 = vmatpush3.bf16.msra.mxu0 %v362_v2  ;;  %v133_v27 = vsub.s32 0, %v132_v26  ;;  %v137_v29 = vsub.s32 1, %v132_v26 }
  0x2d   :  { %188 = vmatpush1.bf16.msra.mxu1 %v368_v9  ;;  %v134_v30 = vrot.slane %v129_v28, %v133_v27  ;;  %v138_v31 = vrot.slane %v129_v28, %v137_v29 }
  0x2e   :  { %350 = vmatmul.mubr.msk.bf16.vlgmr.msra.gmra.mrb[0].mxu0 %vm73_vm1, %v49_v5  ;;  %189 = vmatprep.subr.bf16.mxu1 %v369_v10 }
  0x31   :  { %190 = vmatpush1.bf16.msra.mxu1 %v371_v11 }
  0x32   :  { %191 = vmatprep.subr.bf16.mxu1 %v372_v13 }
  0x35   :  { %192 = vmatpush1.bf16.msra.mxu1 %v374_v14 }
 0x101   :  { %v111_v16 = vpop.f32.mrb[0].mxu0 }
 0x102   :  { %v112_v17 = vadd.f32 %v325_v15, %v111_v16  ;;  %v351_v18 = vpop.f32.mrb[1].mxu0 }
 0x103   :  { %v114_v19 = vpop.f32.mrb[2].mxu0 }
 0x104   :  { %v115_v20 = vadd.f32 %v325_v15, %v114_v19  ;;  %v352_v21 = vpop.f32.mrb[3].mxu0  ;;  %375 = vtanh.f32 %v112_v17 }
 0x106   :  { %377 = vtanh.f32 %v115_v20 }
 0x10e   :  { %v376_v22 = vpop.eup %375 }
 0x110   :  { %v378_v23 = vpop.eup %377 }
 0x111   :  { %v120_v24 = vpack.c.bf16 %v378_v23, %v376_v22 }
 0x113   :  { %337 = vmatmul.mubr.msk.bf16.vlgmr.msra.gmra.mrb[0].mxu1 %vm181_vm2, %v120_v24 }
 0x1e6   :  { %v219_v32 = vpop.f32.mrb[0].mxu1 }
 0x1e7   :  { %v220_v33 = vadd.f32 %v219_v32, %v134_v30  ;;  %v221_v34 = vpop.f32.mrb[1].mxu1 }
 0x1e8   :  { %v222_v35 = vadd.f32 %v221_v34, %v138_v31  ;;  %v223_v36 = vpop.f32.mrb[2].mxu1 }
 0x1e9   :  { %v225_v37 = vpop.f32.mrb[3].mxu1 }
 0x1ea   :  { %v232_v38 = vcombine.low %v220_v33, %v222_v35 }
 0x1ec   :  { %338 = vst.sshfl [vmem:[#allocation6] sm:$0x33 pattern:$0x76325410] %v232_v38 }
 0x1f3   :  { %v301_v39 = vld [vmem:[#allocation6] sm:$0xf] }
 0x1f4   :  { %302 = vst [vmem:[%s511_s5] sm:$0xf] %v301_v39 }
 0x1f5   :  { %319 = vsyncpa [#allocation3], 1 }
 0x1f6   :  { %320 = vsyncpa [#allocation5], 1 }

</bundles_post_ra>
